<compile_context>
chip_gen: v7x
topology: tpu7x:2x2x1
jax: 0.10.0
libtpu: 0.0.40
codegen_flags: <defaults>
</compile_context>

<pallas_src>
import jax
import jax.numpy as jnp
from jax import lax
from jax.experimental import pallas as pl
from jax.experimental.pallas import tpu as pltpu

_LANE = 128
_VMEM_BUDGET = 12 * 1024 * 1024   # conservative working-set target (fits v5e/v6e/v7x)
_VMEM_LIMIT = 32 * 1024 * 1024    # scoped-VMEM limit handed to the compiler
_MAX_TB = 2048                    # batch-tile cap (review #8)


def _round_up(x, m):
    return (x + m - 1) // m * m


def prepare_tables(target_emb, context_emb, table_dtype=jnp.float32):
    """Transpose (V, E) -> (E, V) (and optionally cast) ONCE; reuse across
    forward calls in a training loop instead of re-transposing per step."""
    tgtT = jnp.asarray(target_emb).astype(table_dtype).T    # (E, V)
    ctxT = jnp.asarray(context_emb).astype(table_dtype).T   # (E, Vc)
    return tgtT, ctxT


def _per_column_bytes(E, V_total, table_itemsize):
    # Per batch-column VMEM working set inside one grid step:
    #   int32 iotas (V, tb) + (Vc, tb)               : 4 * V_total
    #   one-hot selectors in the table dtype          : itemsize * V_total
    #   t_cols + c_cols + product, all f32 (E, tb)    : 12 * E
    #   idx tiles (2 inputs x 2 bufs, i32) + out tile : ~24
    return (4 + table_itemsize) * V_total + 12 * E + 24


def skipgram_kernel(tgt_idx_ref, ctx_idx_ref, tgtT_ref, ctxT_ref, out_ref):
    """One grid step = one tile of TB batch elements.

    tgt_idx_ref / ctx_idx_ref : VMEM i32 (1, TB)        indices for this tile
    tgtT_ref / ctxT_ref       : VMEM (E, V) / (E, Vc)   full tables, resident
    out_ref                   : VMEM f32 (1, TB)        lane-dense result tile
    """
    V = tgtT_ref.shape[1]
    Vc = ctxT_ref.shape[1]
    tb = out_ref.shape[1]
    sel_dtype = tgtT_ref.dtype

    # One-hot selectors (V, TB) / (Vc, TB). 0/1 are exactly representable in
    # both f32 and bf16, so the MXU "gather" below selects table entries
    # exactly (in the table dtype).
    t_sel = (lax.broadcasted_iota(jnp.int32, (V, tb), 0)
             == tgt_idx_ref[...]).astype(jnp.float32).astype(sel_dtype)
    c_sel = (lax.broadcasted_iota(jnp.int32, (Vc, tb), 0)
             == ctx_idx_ref[...]).astype(jnp.float32).astype(sel_dtype)

    # Gather TB embedding columns via MXU: (E, V) @ (V, TB) -> (E, TB), f32 acc.
    t_cols = jnp.dot(tgtT_ref[...], t_sel, preferred_element_type=jnp.float32)
    c_cols = jnp.dot(ctxT_ref[...], c_sel, preferred_element_type=jnp.float32)

    # Batched dot product: VPU elementwise mul + reduce over the embed
    # (sublane) axis -> result is already lane-major for one unmasked store.
    out_ref[...] = jnp.sum(t_cols * c_cols, axis=0, keepdims=True)  # (1, TB)


def skipgram_forward_tables(x_target, x_context, tgtT, ctxT, *, tb=None):
    """x_*: int [B]; tgtT: [E, V]; ctxT: [E, Vc] (from prepare_tables) -> f32 [B]."""
    assert tgtT.dtype == ctxT.dtype, "both tables must share a dtype"
    E, V = tgtT.shape
    Ec, Vc = ctxT.shape
    assert E == Ec, "embedding sizes must match"
    B = int(x_target.shape[0])
    V_total = V + Vc
    itemsize = jnp.dtype(tgtT.dtype).itemsize
    table_bytes = itemsize * E * V_total            # single-buffered residents
    per_col = _per_column_bytes(E, V_total, itemsize)

    if tb is None:
        avail = _VMEM_BUDGET - table_bytes
        assert avail >= per_col * _LANE, (
            "vocab/embed too large for the VMEM-resident one-hot gather "
            "variant (see TODO(synk): scalar-prefetch row-gather fallback)")
        tb_cap = min(_MAX_TB, (avail // per_col) // _LANE * _LANE)
        b_lanes = _round_up(max(B, 1), _LANE)
        if b_lanes <= _LANE:
            tb = _LANE                    # can't split below one lane width
        else:
            # At least 2 tiles so the "parallel" grid axis can shard across
            # both TensorCores on v7x.
            tb = min(tb_cap, _round_up(pl.cdiv(b_lanes, 2), _LANE))
    else:
        tb = max(_LANE, _round_up(int(tb), _LANE))

    footprint = table_bytes + per_col * tb
    assert footprint <= _VMEM_BUDGET, (
        f"VMEM working set {footprint} B exceeds budget {_VMEM_BUDGET} B; "
        "reduce tb or switch to the row-gather path")

    b_pad = _round_up(max(B, 1), tb)
    n_tiles = b_pad // tb

    def _pad_idx(x):
        x = jnp.asarray(x).astype(jnp.int32)
        if b_pad != B:
            x = jnp.pad(x, (0, b_pad - B))   # pad with row 0 (valid); sliced off below
        return x.reshape(1, b_pad)

    tgt_idx = _pad_idx(x_target)
    ctx_idx = _pad_idx(x_context)

    out = pl.pallas_call(
        skipgram_kernel,
        out_shape=jax.ShapeDtypeStruct((1, b_pad), jnp.float32),
        grid=(n_tiles,),
        in_specs=[
            pl.BlockSpec((1, tb), lambda i: (0, i)),   # target indices tile
            pl.BlockSpec((1, tb), lambda i: (0, i)),   # context indices tile
            # Whole tables resident in VMEM for the entire grid. Memory-space-
            # only specs are single-buffered: no per-step DMA and no 2x
            # double-buffer footprint (constant index_map would double it).
            pl.BlockSpec(memory_space=pltpu.MemorySpace.VMEM),
            pl.BlockSpec(memory_space=pltpu.MemorySpace.VMEM),
        ],
        out_specs=pl.BlockSpec((1, tb), lambda i: (0, i)),  # lane-dense tile
        compiler_params=pltpu.CompilerParams(
            dimension_semantics=("parallel",),   # independent batch tiles -> megacore
            vmem_limit_bytes=_VMEM_LIMIT,
        ),
    )(tgt_idx, ctx_idx, tgtT, ctxT)

    return out[0, :B]


def skipgram_forward(x_target, x_context, target_emb, context_emb, *, tb=None,
                     table_dtype=jnp.float32):
    """Module-equivalent API. For a training loop, prefer prepare_tables() once
    + skipgram_forward_tables() per step (avoids per-call transpose traffic)."""
    tgtT, ctxT = prepare_tables(target_emb, context_emb, table_dtype)
    return skipgram_forward_tables(x_target, x_context, tgtT, ctxT, tb=tb)


if __name__ == "__main__":
    # Small shapes consistent with the module's forward pass.
    vocab_size = 32
    context_vocab_size = 48
    embed_size = 128
    batch_size = 8

    key = jax.random.PRNGKey(0)
    k_t, k_c, k_it, k_ic, k_it2, k_ic2 = jax.random.split(key, 6)

    # nn.Embedding default init: weights ~ N(0, 1).
    target_embedding = jax.random.normal(k_t, (vocab_size, embed_size), dtype=jnp.float32)
    context_embedding = jax.random.normal(k_c, (context_vocab_size, embed_size), dtype=jnp.float32)

    x_target = jax.random.randint(k_it, (batch_size,), 0, vocab_size, dtype=jnp.int32)
    x_context = jax.random.randint(k_ic, (batch_size,), 0, context_vocab_size, dtype=jnp.int32)

    # --- f32 path (matches PyTorch float32 semantics); tables prepared once. ---
    tgtT, ctxT = prepare_tables(target_embedding, context_embedding)
    out = jax.block_until_ready(
        skipgram_forward_tables(x_target, x_context, tgtT, ctxT))
    ref = jnp.sum(target_embedding[x_target] * context_embedding[x_context], axis=1)
    assert out.shape == (batch_size,)
    assert jnp.allclose(out, ref, atol=1e-4, rtol=1e-4), (out, ref)

    # --- multi-tile f32 path (exercises >=2 parallel tiles + batch padding). ---
    big_batch = 300
    x_target_b = jax.random.randint(k_it2, (big_batch,), 0, vocab_size, dtype=jnp.int32)
    x_context_b = jax.random.randint(k_ic2, (big_batch,), 0, context_vocab_size, dtype=jnp.int32)
    out_b = jax.block_until_ready(
        skipgram_forward_tables(x_target_b, x_context_b, tgtT, ctxT))
    ref_b = jnp.sum(target_embedding[x_target_b] * context_embedding[x_context_b], axis=1)
    assert out_b.shape == (big_batch,)
    assert jnp.allclose(out_b, ref_b, atol=1e-4, rtol=1e-4)

    # --- optional bf16-gather fast path (halves table VMEM, bf16-native MXU);
    #     compared against a bf16-consistent reference. ---
    tgtT16, ctxT16 = prepare_tables(target_embedding, context_embedding, jnp.bfloat16)
    out16 = jax.block_until_ready(
        skipgram_forward_tables(x_target, x_context, tgtT16, ctxT16))
    t16 = target_embedding.astype(jnp.bfloat16).astype(jnp.float32)
    c16 = context_embedding.astype(jnp.bfloat16).astype(jnp.float32)
    ref16 = jnp.sum(t16[x_target] * c16[x_context], axis=1)
    assert jnp.allclose(out16, ref16, atol=1e-3, rtol=1e-3)

    print("KERNEL_OK")
</pallas_src>

<mosaic_0001>
module attributes {stable_mosaic.version = 11 : i64} {
  func.func @skipgram_kernel(%arg0: i32, %arg1: memref<1x128xi32, #tpu.memory_space<vmem>>, %arg2: memref<1x128xi32, #tpu.memory_space<vmem>>, %arg3: memref<128x32xf32, #tpu.memory_space<vmem>>, %arg4: memref<128x48xf32, #tpu.memory_space<vmem>>, %arg5: memref<1x128xf32, #tpu.memory_space<vmem>>) attributes {dimension_semantics = [#tpu.dimension_semantics<parallel>], iteration_bounds = array<i64: 1>, scalar_prefetch = 0 : i64, scratch_operands = 0 : i64, tpu.core_type = #tpu.core_type<tc>, window_params = [{transform_indices = @transform_0, window_bounds = array<i64: 1, 128>}, {transform_indices = @transform_1, window_bounds = array<i64: 1, 128>}, {pipeline_mode = #tpu.pipeline_mode<synchronous>, transform_indices = @transform_2, window_bounds = array<i64: 128, 32>}, {pipeline_mode = #tpu.pipeline_mode<synchronous>, transform_indices = @transform_3, window_bounds = array<i64: 128, 48>}, {transform_indices = @transform_4, window_bounds = array<i64: 1, 128>}]} {
    %0 = tpu.iota {dimensions = array<i32: 0>} : vector<32x128xi32>
    %c0 = arith.constant 0 : index
    %c0_0 = arith.constant 0 : index
    %1 = vector.load %arg1[%c0, %c0_0] : memref<1x128xi32, #tpu.memory_space<vmem>>, vector<1x128xi32>
    %2 = vector.broadcast %1 : vector<1x128xi32> to vector<32x128xi32>
    %3 = arith.cmpi eq, %0, %2 : vector<32x128xi32>
    %4 = arith.extui %3 : vector<32x128xi1> to vector<32x128xi32>
    %5 = arith.sitofp %4 : vector<32x128xi32> to vector<32x128xf32>
    %6 = tpu.iota {dimensions = array<i32: 0>} : vector<48x128xi32>
    %c0_1 = arith.constant 0 : index
    %c0_2 = arith.constant 0 : index
    %7 = vector.load %arg2[%c0_1, %c0_2] : memref<1x128xi32, #tpu.memory_space<vmem>>, vector<1x128xi32>
    %8 = vector.broadcast %7 : vector<1x128xi32> to vector<48x128xi32>
    %9 = arith.cmpi eq, %6, %8 : vector<48x128xi32>
    %10 = arith.extui %9 : vector<48x128xi1> to vector<48x128xi32>
    %11 = arith.sitofp %10 : vector<48x128xi32> to vector<48x128xf32>
    %c0_3 = arith.constant 0 : index
    %c0_4 = arith.constant 0 : index
    %12 = vector.load %arg3[%c0_3, %c0_4] : memref<128x32xf32, #tpu.memory_space<vmem>>, vector<128x32xf32>
    %cst = arith.constant dense<0.000000e+00> : vector<128x128xf32>
    %13 = tpu.matmul %12, %5, %cst {dimension_numbers = #tpu.dot_dimension_numbers<[1], [0], [0], [1], [0, 0, 1, 1], [], []>} : vector<128x32xf32>, vector<32x128xf32>, vector<128x128xf32> -> vector<128x128xf32>
    %c0_5 = arith.constant 0 : index
    %c0_6 = arith.constant 0 : index
    %14 = vector.load %arg4[%c0_5, %c0_6] : memref<128x48xf32, #tpu.memory_space<vmem>>, vector<128x48xf32>
    %cst_7 = arith.constant dense<0.000000e+00> : vector<128x128xf32>
    %15 = tpu.matmul %14, %11, %cst_7 {dimension_numbers = #tpu.dot_dimension_numbers<[1], [0], [0], [1], [0, 0, 1, 1], [], []>} : vector<128x48xf32>, vector<48x128xf32>, vector<128x128xf32> -> vector<128x128xf32>
    %16 = arith.mulf %13, %15 : vector<128x128xf32>
    %cst_8 = arith.constant dense<0.000000e+00> : vector<128xf32>
    %17 = vector.multi_reduction <add>, %16, %cst_8 [0] : vector<128x128xf32> to vector<128xf32>
    %18 = vector.shape_cast %17 : vector<128xf32> to vector<1x128xf32>
    %c0_9 = arith.constant 0 : index
    %c0_10 = arith.constant 0 : index
    %19 = vector.load %arg5[%c0_9, %c0_10] : memref<1x128xf32, #tpu.memory_space<vmem>>, vector<1x128xf32>
    tpu.vector_store %arg5[%c0_9, %c0_10], %18 {strides = array<i32>} : memref<1x128xf32, #tpu.memory_space<vmem>>, vector<1x128xf32>,
    return
  }
  func.func @transform_0(%arg0: i32) -> (i32, i32) {
    %c0_i32 = arith.constant 0 : i32
    %c0_i32_0 = arith.constant 0 : i32
    return %c0_i32, %arg0 : i32, i32
  }
  func.func @transform_1(%arg0: i32) -> (i32, i32) {
    %c0_i32 = arith.constant 0 : i32
    %c0_i32_0 = arith.constant 0 : i32
    return %c0_i32, %arg0 : i32, i32
  }
  func.func @transform_2(%arg0: i32) -> (i32, i32) {
    %c0_i32 = arith.constant 0 : i32
    %c0_i32_0 = arith.constant 0 : i32
    %c0_i32_1 = arith.constant 0 : i32
    return %c0_i32, %c0_i32_0 : i32, i32
  }
  func.func @transform_3(%arg0: i32) -> (i32, i32) {
    %c0_i32 = arith.constant 0 : i32
    %c0_i32_0 = arith.constant 0 : i32
    %c0_i32_1 = arith.constant 0 : i32
    return %c0_i32, %c0_i32_0 : i32, i32
  }
  func.func @transform_4(%arg0: i32) -> (i32, i32) {
    %c0_i32 = arith.constant 0 : i32
    %c0_i32_0 = arith.constant 0 : i32
    return %c0_i32, %arg0 : i32, i32
  }
}

</mosaic_0001>

<bundles_post_ra>
// kernel: tpu_custom_call.1
= control target key start
LH: loop header
LB: loop body
LE: loop exit
PB: predicated region body
PF: predicated region fallthrough
CT: control target
= control target key end

     0   :  { %v18_v0 = vlaneseq  ;;  %vm81_vm0 = vcmask 261120   ;;  %vm925_vm1 = vcmask 392192   ;;  %v747_v11 = vmov 1.0|1.0   ;;  %s920_s0 = inlined_call_operand.vmem [shape: s32[1,128], index: 0, kind: input, shape index: {}]   ;;  %s921_s1 = inlined_call_operand.vmem [shape: s32[1,128], index: 1, kind: input, shape index: {}]   ;;  %s922_s2 = inlined_call_operand.vmem [shape: f32[128,32], index: 2, kind: input, shape index: {}]   ;;  %s923_s3 = inlined_call_operand.vmem [shape: f32[128,48], index: 3, kind: input, shape index: {}]   ;;  %s924_s4 = inlined_call_operand.hbm [shape: f32[1,128], index: 4, kind: output, shape index: {}]  }
   0x1   :  { %v542_v1 = vld [vmem:[%s921_s1] ss:$0 sm:$0xff] }
   0x2   :  { %v65_v2 = vld [vmem:[%s922_s2] sm:$0xff]  ;;  %v19_v4 = vshrl.u32 %v18_v0, 7 }
   0x3   :  { %v275_v3 = vld [vmem:[%s923_s3] sm:$0xff]  ;;  %641 = vmatprep.mubr.msk.f32.mxu0 %vm81_vm0, %v65_v2 }
   0x4   :  { %v537_v5 = vld [vmem:[%s920_s0] ss:$0 sm:$0xff]  ;;  %677 = vmatprep.mubr.msk.f32.mxu1 %vm925_vm1, %v275_v3  ;;  %v20_v6 = vadd.s32 8, %v19_v4  ;;  %vm47_vm2 = vcmp.eq.s32.totalorder %v19_v4, %v542_v1  ;;  %v21_v7 = vadd.s32 16, %v19_v4  ;;  %v22_v8 = vadd.s32 24, %v19_v4 }
   0x5   :  { %vm28_vm3 = vcmp.eq.s32.totalorder %v19_v4, %v537_v5  ;;  %v40_v9 = vadd.s32 32, %v19_v4  ;;  %v41_v10 = vadd.s32 40, %v19_v4 }
   0x6   :  { %vm48_vm4 = vcmp.eq.s32.totalorder %v20_v6, %v542_v1  ;;  %vm29_vm5 = vcmp.eq.s32.totalorder %v20_v6, %v537_v5  ;;  %vm49_vm6 = vcmp.eq.s32.totalorder %v21_v7, %v542_v1  ;;  %vm50_vm8 = vcmp.eq.s32.totalorder %v22_v8, %v542_v1 }
   0x7   :  { %vm709_vm7 = vmpackc.low %vm48_vm4, %vm47_vm2  ;;  %vm30_vm9 = vcmp.eq.s32.totalorder %v21_v7, %v537_v5  ;;  %vm31_vm10 = vcmp.eq.s32.totalorder %v22_v8, %v537_v5  ;;  %vm51_vm12 = vcmp.eq.s32.totalorder %v40_v9, %v542_v1  ;;  %vm52_vm13 = vcmp.eq.s32.totalorder %v41_v10, %v542_v1 }
   0x8   :  { %710 = vmatprep.subr.msk.bf16.mxu1 %vm709_vm7, %v747_v11  ;;  %vm701_vm11 = vmpackc.low %vm29_vm5, %vm28_vm3 }
   0x9   :  { %712 = vmatpush3.bf16.msk.msra.mxu1 %vm709_vm7, %v747_v11  ;;  %702 = vmatprep.subr.msk.bf16.mxu0 %vm701_vm11, %v747_v11  ;;  %vm713_vm14 = vmpackc.low %vm50_vm8, %vm49_vm6 }
   0xa   :  { %704 = vmatpush3.bf16.msk.msra.mxu0 %vm701_vm11, %v747_v11  ;;  %714 = vmatprep.subr.msk.bf16.mxu1 %vm713_vm14, %v747_v11  ;;  %vm705_vm15 = vmpackc.low %vm31_vm10, %vm30_vm9 }
   0xb   :  { %706 = vmatprep.subr.msk.bf16.mxu0 %vm705_vm15, %v747_v11  ;;  %vm717_vm1 = vmpackc.low %vm52_vm13, %vm51_vm12 }
   0xd   :  { %716 = vmatpush3.bf16.msk.msra.mxu1 %vm713_vm14, %v747_v11 }
   0xe   :  { %9 = vsyncpa [#allocation3], 0  ;;  %708 = vmatpush3.bf16.msk.msra.mxu0 %vm705_vm15, %v747_v11  ;;  %718 = vmatprep.subr.msk.bf16.mxu1 %vm717_vm1, %v747_v11  ;;  %v66_v12 = vld [vmem:[%s922_s2 + $0x8] sm:$0xff]  ;;  %v67_v13 = vld [vmem:[%s922_s2 + $0x10] sm:$0xff] }
   0xf   :  { %v276_v14 = vld [vmem:[%s923_s3 + $0x8] sm:$0xff]  ;;  %v68_v15 = vld [vmem:[%s922_s2 + $0x18] sm:$0xff]  ;;  %v277_v16 = vld [vmem:[%s923_s3 + $0x10] sm:$0xff] }
  0x10   :  { %v69_v17 = vld [vmem:[%s922_s2 + $0x20] sm:$0xff]  ;;  %v278_v18 = vld [vmem:[%s923_s3 + $0x18] sm:$0xff]  ;;  %v70_v19 = vld [vmem:[%s922_s2 + $0x28] sm:$0xff] }
  0x11   :  { %720 = vmatpush3.bf16.msk.msra.mxu1 %vm717_vm1, %v747_v11  ;;  %642 = vmatmul.mubr.msk.f32.vlgmr.msra.gmra.mrb[0].mxu0 %vm81_vm0, %v66_v12  ;;  %vm926_vm1 = vcmask 392192   ;;  %v279_v20 = vld [vmem:[%s923_s3 + $0x20] sm:$0xff]  ;;  %v71_v21 = vld [vmem:[%s922_s2 + $0x30] sm:$0xff]  ;;  %v280_v22 = vld [vmem:[%s923_s3 + $0x28] sm:$0xff] }
  0x12   :  { %644 = vmatprep.mubr.msk.f32.mxu0 %vm81_vm0, %v67_v13  ;;  %vm927_vm2 = vmmov %vm926_vm1  ;;  %v72_v23 = vld [vmem:[%s922_s2 + $0x38] sm:$0xff]  ;;  %v281_v24 = vld [vmem:[%s923_s3 + $0x30] sm:$0xff] }
  0x13   :  { %vm928_vm3 = vmmov %vm926_vm1  ;;  %v73_v25 = vld [vmem:[%s922_s2 + $0x40] sm:$0xff]  ;;  %v282_v26 = vld [vmem:[%s923_s3 + $0x38] sm:$0xff] }
  0x14   :  { %678 = vmatmul.mubr.msk.f32.vlgmr.msra.gmra.mrb[0].mxu1 %vm926_vm1, %v276_v14  ;;  %vm929_vm4 = vmmov %vm926_vm1  ;;  %v74_v27 = vld [vmem:[%s922_s2 + $0x48] sm:$0xff]  ;;  %v283_v28 = vld [vmem:[%s923_s3 + $0x40] sm:$0xff] }
  0x15   :  { %645 = vmatmul.mubr.msk.f32.gmra.mrb[2].mxu0 %vm81_vm0, %v68_v15  ;;  %680 = vmatprep.mubr.msk.f32.mxu1 %vm927_vm2, %v277_v16  ;;  %vm930_vm5 = vmmov %vm926_vm1  ;;  %v75_v29 = vld [vmem:[%s922_s2 + $0x50] sm:$0xff]  ;;  %v284_v30 = vld [vmem:[%s923_s3 + $0x48] sm:$0xff] }
  0x16   :  { %647 = vmatprep.mubr.msk.f32.mxu0 %vm81_vm0, %v69_v17  ;;  %vm931_vm6 = vmmov %vm926_vm1  ;;  %v76_v31 = vld [vmem:[%s922_s2 + $0x58] sm:$0xff]  ;;  %v285_v32 = vld [vmem:[%s923_s3 + $0x50] sm:$0xff] }
  0x17   :  { %vm932_vm7 = vmmov %vm926_vm1  ;;  %v77_v33 = vld [vmem:[%s922_s2 + $0x60] sm:$0xff]  ;;  %v286_v34 = vld [vmem:[%s923_s3 + $0x58] sm:$0xff] }
  0x18   :  { %681 = vmatmul.mubr.msk.f32.gmra.mrb[2].mxu1 %vm928_vm3, %v278_v18  ;;  %vm933_vm8 = vmmov %vm926_vm1  ;;  %v78_v35 = vld [vmem:[%s922_s2 + $0x68] sm:$0xff]  ;;  %v287_v36 = vld [vmem:[%s923_s3 + $0x60] sm:$0xff] }
  0x19   :  { %648 = vmatmul.mubr.msk.f32.gmra.mrb[4].mxu0 %vm81_vm0, %v70_v19  ;;  %683 = vmatprep.mubr.msk.f32.mxu1 %vm929_vm4, %v279_v20  ;;  %vm934_vm9 = vmmov %vm926_vm1  ;;  %v79_v37 = vld [vmem:[%s922_s2 + $0x70] sm:$0xff]  ;;  %v288_v38 = vld [vmem:[%s923_s3 + $0x68] sm:$0xff] }
  0x1a   :  { %650 = vmatprep.mubr.msk.f32.mxu0 %vm81_vm0, %v71_v21  ;;  %vm935_vm10 = vmmov %vm926_vm1  ;;  %v80_v39 = vld [vmem:[%s922_s2 + $0x78] sm:$0xff]  ;;  %v289_v40 = vld [vmem:[%s923_s3 + $0x70] sm:$0xff]  ;;  %s748_s2 = smov [#allocation2]  }
  0x1b   :  { %vm936_vm11 = vmmov %vm926_vm1  ;;  %v290_v41 = vld [vmem:[%s923_s3 + $0x78] sm:$0xff]  ;;  %s529_s3 = sshll.u32 %s748_s2, 4  ;;  %s530_s3 = int_to_ptr.vmem [resolvable:$true] %s529_s3 }
  0x1c   :  { %684 = vmatmul.mubr.msk.f32.gmra.mrb[4].mxu1 %vm930_vm5, %v280_v22  ;;  %vm937_vm12 = vmmov %vm926_vm1  ;;  %s723_s25 = scalar_lea.vmem %s530_s3, 16  ;;  %s727_s26 = scalar_lea.vmem %s530_s3, 32 }
  0x1d   :  { %651 = vmatmul.mubr.msk.f32.gmra.mrb[6].mxu0 %vm81_vm0, %v72_v23  ;;  %686 = vmatprep.mubr.msk.f32.mxu1 %vm931_vm6, %v281_v24  ;;  %vm938_vm13 = vmmov %vm926_vm1  ;;  %p724_p0 = scmp.ne.s32.totalorder %s530_s3, %s723_s25  ;;  %p728_p1 = scmp.lt.s32.totalorder %s530_s3, %s530_s3 }
  0x1e   :  { %653 = vmatprep.mubr.msk.f32.mxu0 %vm81_vm0, %v73_v25  ;;  %vm939_vm14 = vmmov %vm926_vm1  ;;  %p729_p2 = scmp.lt.s32.totalorder %s727_s26, %s723_s25 }
  0x1f   :  { %vm940_vm15 = vmmov %vm926_vm1 }
  0x20   :  { %687 = vmatmul.mubr.msk.f32.gmra.mrb[6].mxu1 %vm932_vm7, %v282_v26  ;;  %p730_p3 = por %p729_p2, %p728_p1 }
  0x21   :  { %654 = vmatmul.mubr.msk.f32.gmra.mrb[8].mxu0 %vm81_vm0, %v74_v27  ;;  %689 = vmatprep.mubr.msk.f32.mxu1 %vm933_vm8, %v283_v28 }
  0x22   :  { %656 = vmatprep.mubr.msk.f32.mxu0 %vm81_vm0, %v75_v29  ;;  %p731_p4 = pnand %p730_p3, %p724_p0 }
  0x24   :  { %690 = vmatmul.mubr.msk.f32.gmra.mrb[8].mxu1 %vm934_vm9, %v284_v30 }
  0x25   :  { %657 = vmatmul.mubr.msk.f32.gmra.mrb[10].mxu0 %vm81_vm0, %v76_v31  ;;  %692 = vmatprep.mubr.msk.f32.mxu1 %vm935_vm10, %v285_v32 }
  0x26   :  { %659 = vmatprep.mubr.msk.f32.mxu0 %vm81_vm0, %v77_v33 }
  0x28   :  { %693 = vmatmul.mubr.msk.f32.gmra.mrb[10].mxu1 %vm936_vm11, %v286_v34 }
  0x29   :  { %660 = vmatmul.mubr.msk.f32.gmra.mrb[12].mxu0 %vm81_vm0, %v78_v35  ;;  %695 = vmatprep.mubr.msk.f32.mxu1 %vm937_vm12, %v287_v36 }
  0x2a   :  { %662 = vmatprep.mubr.msk.f32.mxu0 %vm81_vm0, %v79_v37 }
  0x2c   :  { %696 = vmatmul.mubr.msk.f32.gmra.mrb[12].mxu1 %vm938_vm13, %v288_v38 }
  0x2d   :  { %663 = vmatmul.mubr.msk.f32.gmra.mrb[14].mxu0 %vm81_vm0, %v80_v39  ;;  %698 = vmatprep.mubr.msk.f32.mxu1 %vm939_vm14, %v289_v40 }
  0x30   :  { %699 = vmatmul.mubr.msk.f32.gmra.mrb[14].mxu1 %vm940_vm15, %v290_v41 }
  0xe4   :  { %v643_v42 = vpop.f32.mrb[0].mxu0 }
  0xe5   :  { %v196_v43 = vpop.f32.mrb[1].mxu0 }
  0xe7   :  { %v679_v44 = vpop.f32.mrb[0].mxu1 }
  0xe8   :  { %v486_v45 = vmul.f32 %v679_v44, %v643_v42  ;;  %v406_v46 = vpop.f32.mrb[1].mxu1  ;;  %v646_v47 = vpop.f32.mrb[2].mxu0 }
  0xe9   :  { %v485_v48 = vmul.f32 %v406_v46, %v196_v43  ;;  %v206_v49 = vpop.f32.mrb[3].mxu0 }
  0xeb   :  { %v501_v50 = vadd.f32 %v486_v45, %v485_v48  ;;  %v682_v51 = vpop.f32.mrb[2].mxu1 }
  0xec   :  { %v488_v52 = vmul.f32 %v682_v51, %v646_v47  ;;  %v416_v53 = vpop.f32.mrb[3].mxu1  ;;  %v649_v54 = vpop.f32.mrb[4].mxu0 }
  0xed   :  { %v487_v55 = vmul.f32 %v416_v53, %v206_v49  ;;  %v216_v56 = vpop.f32.mrb[5].mxu0 }
  0xef   :  { %v502_v57 = vadd.f32 %v501_v50, %v487_v55  ;;  %v685_v58 = vpop.f32.mrb[4].mxu1 }
  0xf0   :  { %v490_v59 = vmul.f32 %v685_v58, %v649_v54  ;;  %v426_v60 = vpop.f32.mrb[5].mxu1  ;;  %v652_v61 = vpop.f32.mrb[6].mxu0 }
  0xf1   :  { %v489_v62 = vmul.f32 %v426_v60, %v216_v56  ;;  %v503_v63 = vadd.f32 %v502_v57, %v488_v52  ;;  %v226_v0 = vpop.f32.mrb[7].mxu0 }
  0xf3   :  { %v504_v1 = vadd.f32 %v503_v63, %v489_v62  ;;  %v688_v2 = vpop.f32.mrb[6].mxu1 }
  0xf4   :  { %v492_v3 = vmul.f32 %v688_v2, %v652_v61  ;;  %v436_v4 = vpop.f32.mrb[7].mxu1  ;;  %v655_v5 = vpop.f32.mrb[8].mxu0 }
  0xf5   :  { %v491_v6 = vmul.f32 %v436_v4, %v226_v0  ;;  %v505_v7 = vadd.f32 %v504_v1, %v490_v59  ;;  %v236_v8 = vpop.f32.mrb[9].mxu0 }
  0xf7   :  { %v506_v9 = vadd.f32 %v505_v7, %v491_v6  ;;  %v691_v10 = vpop.f32.mrb[8].mxu1 }
  0xf8   :  { %v494_v11 = vmul.f32 %v691_v10, %v655_v5  ;;  %v446_v12 = vpop.f32.mrb[9].mxu1  ;;  %v658_v13 = vpop.f32.mrb[10].mxu0 }
  0xf9   :  { %v493_v14 = vmul.f32 %v446_v12, %v236_v8  ;;  %v507_v15 = vadd.f32 %v506_v9, %v492_v3  ;;  %v246_v16 = vpop.f32.mrb[11].mxu0 }
  0xfb   :  { %v508_v17 = vadd.f32 %v507_v15, %v493_v14  ;;  %v694_v18 = vpop.f32.mrb[10].mxu1 }
  0xfc   :  { %v496_v19 = vmul.f32 %v694_v18, %v658_v13  ;;  %v456_v20 = vpop.f32.mrb[11].mxu1  ;;  %v661_v21 = vpop.f32.mrb[12].mxu0 }
  0xfd   :  { %v495_v22 = vmul.f32 %v456_v20, %v246_v16  ;;  %v509_v23 = vadd.f32 %v508_v17, %v494_v11  ;;  %v256_v24 = vpop.f32.mrb[13].mxu0 }
  0xff   :  { %v510_v25 = vadd.f32 %v509_v23, %v495_v22  ;;  %v697_v26 = vpop.f32.mrb[12].mxu1 }
 0x100   :  { %v498_v27 = vmul.f32 %v697_v26, %v661_v21  ;;  %v466_v28 = vpop.f32.mrb[13].mxu1  ;;  %v664_v29 = vpop.f32.mrb[14].mxu0 }
 0x101   :  { %v497_v30 = vmul.f32 %v466_v28, %v256_v24  ;;  %v511_v31 = vadd.f32 %v510_v25, %v496_v19  ;;  %v266_v32 = vpop.f32.mrb[15].mxu0 }
 0x103   :  { %v512_v33 = vadd.f32 %v511_v31, %v497_v30  ;;  %v700_v34 = vpop.f32.mrb[14].mxu1 }
 0x104   :  { %v500_v35 = vmul.f32 %v700_v34, %v664_v29  ;;  %v476_v36 = vpop.f32.mrb[15].mxu1 }
 0x105   :  { %v499_v37 = vmul.f32 %v476_v36, %v266_v32  ;;  %v513_v38 = vadd.f32 %v512_v33, %v498_v27 }
 0x107   :  { %v514_v39 = vadd.f32 %v513_v38, %v499_v37 }
 0x109   :  { %v515_v40 = vadd.f32 %v514_v39, %v500_v35 }
 0x10b   :  { %v516_v41 = vrot.slane %v515_v40, 4 }
 0x10d   :  { %v517_v42 = vadd.f32 %v516_v41, %v515_v40 }
 0x10f   :  { %v518_v43 = vrot.slane %v517_v42, 2 }
 0x111   :  { %v519_v44 = vadd.f32 %v518_v43, %v517_v42 }
 0x113   :  { %v520_v45 = vrot.slane %v519_v44, 1 }
 0x115   :  { %v521_v46 = vadd.f32 %v520_v45, %v519_v44 }
 0x117   :  { %522 = vst [vmem:[#allocation2] sm:$0x1] %v521_v46 }
 0x118   :  { %734 = shalt.err (!%p731_p4)
}
 0x119   :  { %s735_s29 = scalar_lea.hbm %s924_s4, 16 }
 0x11a   :  { %p736_p5 = scmp.ne.s32.totalorder %s924_s4, %s735_s29  ;;  %p739_p6 = scmp.lt.u32.totalorder %s735_s29, %s924_s4 }
 0x11c   :  { %p741_p7 = pnand %p739_p6, %p736_p5 }
 0x11e   :  { %744 = shalt.err (!%p741_p7)
}
 0x11f   :  { %532 = dma.vmem_to_hbm [thread:$0]  %s530_s3, 16, %s924_s4, [#allocation3]  }
 0x120   :  { %745 = dma.done.wait [#allocation3], 16  }
 0x121   :  { %746 = vsyncadd [#allocation3], 4294967280 }
 0x122   :  { %536 = vsyncpa [#allocation3], 1 }

</bundles_post_ra>
